<compile_context>
chip_gen: v6e
topology: v6e:2x2x1
jax: 0.10.0
libtpu: 0.0.40
codegen_flags: <defaults>
</compile_context>

<pallas_src>
import functools

import jax
import jax.numpy as jnp
from jax.experimental import pallas as pl
from jax.experimental.pallas import tpu as pltpu

_LANE = 128
_VMEM_WORKING_SET = 24 * 1024 * 1024   # double-buffered in+out blocks budget
_VMEM_LIMIT_BYTES = 48 * 1024 * 1024   # safe on v7x (64 MiB) and v5e/v6e
_MAX_TILE = 32768                      # lane-tile cap (128-multiple)


def _round_up(x, m):
    return (x + m - 1) // m * m


def _plan_tiling(batch, c_in, c_out, tv, itemsize):
    """Choose (batch_block, lane_tile) for (Bb, C, TILE) blocks.

    The lane tile is picked from the VMEM budget first (never collapses to 128
    just because it does not divide TV); the grid uses cdiv so partial last
    blocks are handled by Pallas masking.
    """
    tv_pad = _round_up(tv, _LANE)
    # Batch block: keep >= 2 grid steps over the batch axis when possible so
    # the v7x megacore (2 TCs) always has parallel work.
    bb = 1 if batch < 4 else min(8, batch // 2)
    # Double-buffered working set: 2 x Bb x (C_in + C_out) x tile x itemsize.
    per_lane = 2 * bb * (c_in + c_out) * itemsize
    tile = (_VMEM_WORKING_SET // per_lane) // _LANE * _LANE
    tile = max(_LANE, min(tile, _MAX_TILE, tv_pad))
    return bb, tile


# ---------------------------------------------------------------------------
# 1x1 convolution (c_in > c_out path):  out[b] = W @ x[b] + bias  on the MXU.
# ---------------------------------------------------------------------------
def _conv1x1_kernel(x_ref, w_ref, b_ref, o_ref):
    # x_ref : (Bb, C_in, TILE)   w_ref : (C_out, C_in)
    # b_ref : (C_out, 1)         o_ref : (Bb, C_out, TILE)
    w = w_ref[...]
    bias = b_ref[...].astype(jnp.float32)
    bb = x_ref.shape[0]
    for b in range(bb):  # small static unroll; each dot is lane-dense
        acc = jnp.dot(w, x_ref[b], preferred_element_type=jnp.float32)
        o_ref[b] = (acc + bias).astype(o_ref.dtype)


def conv1x1(x, weight, bias):
    """x: (B, C_in, T, V), weight: (C_out, C_in), bias: (C_out,)."""
    B, C_in, T, V = x.shape
    C_out = weight.shape[0]
    TV = T * V
    itemsize = jnp.dtype(x.dtype).itemsize
    bb, tile = _plan_tiling(B, C_in, C_out, TV, itemsize)

    x3 = x.reshape(B, C_in, TV)          # free reshape, no transpose
    b2 = bias.reshape(C_out, 1)

    cost = pl.CostEstimate(
        flops=2 * B * C_out * C_in * TV,
        transcendentals=0,
        bytes_accessed=(B * (C_in + C_out) * TV + C_out * C_in + C_out)
        * itemsize,
    )

    out3 = pl.pallas_call(
        _conv1x1_kernel,
        out_shape=jax.ShapeDtypeStruct((B, C_out, TV), x.dtype),
        grid_spec=pltpu.PrefetchScalarGridSpec(
            num_scalar_prefetch=0,
            grid=(pl.cdiv(B, bb), pl.cdiv(TV, tile)),
            in_specs=[
                # activations: lane-dense (Bb, C_in, TILE) blocks
                pl.BlockSpec((bb, C_in, tile), lambda i, j: (i, 0, j)),
                # weight / bias: tiny, constant across the grid
                pl.BlockSpec((C_out, C_in), lambda i, j: (0, 0)),
                pl.BlockSpec((C_out, 1), lambda i, j: (0, 0)),
            ],
            out_specs=pl.BlockSpec((bb, C_out, tile), lambda i, j: (i, 0, j)),
        ),
        compiler_params=pltpu.CompilerParams(
            dimension_semantics=("parallel", "parallel"),
            vmem_limit_bytes=_VMEM_LIMIT_BYTES),
        cost_estimate=cost,
    )(x3, weight, b2)

    return out3.reshape(B, C_out, T, V)


# ---------------------------------------------------------------------------
# Zero-pad channels (c_in < c_out path): one full-height unmasked store.
# ---------------------------------------------------------------------------
def _pad_kernel(x_ref, o_ref):
    # x_ref : (Bb, C_in, TILE)   o_ref : (Bb, C_out, TILE)
    bb, c_out, tile = o_ref.shape
    c_in = x_ref.shape[1]
    zeros = jnp.zeros((bb, c_out - c_in, tile), dtype=o_ref.dtype)
    o_ref[...] = jnp.concatenate([x_ref[...].astype(o_ref.dtype), zeros],
                                 axis=1)


def pad_channels(x, c_out):
    # TODO(synk): in a full model this zero-pad is a pure memcpy+memset and is
    # better left to XLA (jnp.concatenate) so it fuses with neighboring ops;
    # kept as a lane-dense Pallas kernel here per the module spec.
    B, C_in, T, V = x.shape
    TV = T * V
    itemsize = jnp.dtype(x.dtype).itemsize
    bb, tile = _plan_tiling(B, C_in, c_out, TV, itemsize)

    x3 = x.reshape(B, C_in, TV)

    cost = pl.CostEstimate(
        flops=0,
        transcendentals=0,
        bytes_accessed=B * (C_in + c_out) * TV * itemsize,
    )

    out3 = pl.pallas_call(
        _pad_kernel,
        out_shape=jax.ShapeDtypeStruct((B, c_out, TV), x.dtype),
        grid_spec=pltpu.PrefetchScalarGridSpec(
            num_scalar_prefetch=0,
            grid=(pl.cdiv(B, bb), pl.cdiv(TV, tile)),
            in_specs=[pl.BlockSpec((bb, C_in, tile), lambda i, j: (i, 0, j))],
            out_specs=pl.BlockSpec((bb, c_out, tile), lambda i, j: (i, 0, j)),
        ),
        compiler_params=pltpu.CompilerParams(
            dimension_semantics=("parallel", "parallel"),
            vmem_limit_bytes=_VMEM_LIMIT_BYTES),
        cost_estimate=cost,
    )(x3)

    return out3.reshape(B, c_out, T, V)


# ---------------------------------------------------------------------------
# Align module equivalent.
# ---------------------------------------------------------------------------
def init_align_params(key, c_in, c_out, dtype=jnp.float32):
    """Deterministic synthetic init for the 1x1 conv parameters."""
    k_w, k_b = jax.random.split(key)
    fan_in = c_in  # kernel_size = (1, 1)
    bound = 1.0 / jnp.sqrt(fan_in)
    weight = jax.random.uniform(k_w, (c_out, c_in), dtype,
                                minval=-bound, maxval=bound)
    bias = jax.random.uniform(k_b, (c_out,), dtype,
                              minval=-bound, maxval=bound)
    return weight, bias


def align(x, c_in, c_out, weight, bias):
    """Forward pass of Align: x is NCHW = (B, c_in, timestep, n_vertex)."""
    assert x.shape[1] == c_in
    if c_in > c_out:
        return conv1x1(x, weight, bias)
    elif c_in < c_out:
        return pad_channels(x, c_out)
    else:
        return x


# ---------------------------------------------------------------------------
# Reference (plain JAX) for correctness checking.
# ---------------------------------------------------------------------------
def align_ref(x, c_in, c_out, weight, bias):
    if c_in > c_out:
        out = jnp.einsum('bctv,oc->botv', x, weight) + bias[None, :, None, None]
        return out.astype(x.dtype)
    elif c_in < c_out:
        B, _, T, V = x.shape
        pad = jnp.zeros((B, c_out - c_in, T, V), x.dtype)
        return jnp.concatenate([x, pad], axis=1)
    else:
        return x


if __name__ == "__main__":
    key = jax.random.PRNGKey(0)
    B, T, V = 2, 16, 16

    # Case 1: c_in > c_out  -> 1x1 conv (Pallas matmul kernel, lane-dense).
    c_in, c_out = 8, 4
    k1, k2, key = jax.random.split(key, 3)
    x1 = jax.random.normal(k1, (B, c_in, T, V), jnp.float32)
    w1, b1 = init_align_params(k2, c_in, c_out)
    y1 = jax.block_until_ready(align(x1, c_in, c_out, w1, b1))
    y1_ref = align_ref(x1, c_in, c_out, w1, b1)
    assert y1.shape == (B, c_out, T, V)
    assert jnp.allclose(y1, y1_ref, atol=1e-5, rtol=1e-5)

    # Case 2: c_in < c_out  -> zero-pad channels (Pallas pad kernel).
    c_in, c_out = 4, 8
    k3, k4, key = jax.random.split(key, 3)
    x2 = jax.random.normal(k3, (B, c_in, T, V), jnp.float32)
    w2, b2 = init_align_params(k4, c_in, c_out)
    y2 = jax.block_until_ready(align(x2, c_in, c_out, w2, b2))
    y2_ref = align_ref(x2, c_in, c_out, w2, b2)
    assert y2.shape == (B, c_out, T, V)
    assert jnp.allclose(y2, y2_ref)

    # Case 3: c_in == c_out -> identity.
    c_in, c_out = 4, 4
    k5, k6, key = jax.random.split(key, 3)
    x3 = jax.random.normal(k5, (B, c_in, T, V), jnp.float32)
    w3, b3 = init_align_params(k6, c_in, c_out)
    y3 = jax.block_until_ready(align(x3, c_in, c_out, w3, b3))
    assert jnp.array_equal(y3, x3)

    # Case 4: non-128-aligned T*V -> exercises the masked partial lane block
    # (no host-side pad/slice anymore).
    c_in, c_out = 8, 4
    k7, k8, key = jax.random.split(key, 3)
    x4 = jax.random.normal(k7, (B, c_in, 7, 9), jnp.float32)
    w4, b4 = init_align_params(k8, c_in, c_out)
    y4 = jax.block_until_ready(align(x4, c_in, c_out, w4, b4))
    y4_ref = align_ref(x4, c_in, c_out, w4, b4)
    assert y4.shape == (B, c_out, 7, 9)
    assert jnp.allclose(y4, y4_ref, atol=1e-5, rtol=1e-5)

    # Case 5: larger batch -> exercises batch-blocked (Bb > 1) grid steps,
    # plus a partial lane block (T*V = 160, tile = 256).
    c_in, c_out = 16, 8
    k9, k10, key = jax.random.split(key, 3)
    x5 = jax.random.normal(k9, (8, c_in, 4, 40), jnp.float32)
    w5, b5 = init_align_params(k10, c_in, c_out)
    y5 = jax.block_until_ready(align(x5, c_in, c_out, w5, b5))
    y5_ref = align_ref(x5, c_in, c_out, w5, b5)
    assert y5.shape == (8, c_out, 4, 40)
    assert jnp.allclose(y5, y5_ref, atol=1e-5, rtol=1e-5)

    # Case 6: larger batch on the pad path (batch-blocked single-store pad).
    c_in, c_out = 8, 16
    k11, k12, key = jax.random.split(key, 3)
    x6 = jax.random.normal(k11, (8, c_in, 4, 40), jnp.float32)
    w6, b6 = init_align_params(k12, c_in, c_out)
    y6 = jax.block_until_ready(align(x6, c_in, c_out, w6, b6))
    y6_ref = align_ref(x6, c_in, c_out, w6, b6)
    assert y6.shape == (8, c_out, 4, 40)
    assert jnp.allclose(y6, y6_ref)

    print("KERNEL_OK")
</pallas_src>

<mosaic_0001>
module attributes {stable_mosaic.version = 11 : i64} {
  func.func @_conv1x1_kernel(%arg0: i32, %arg1: i32, %arg2: memref<1x8x256xf32, #tpu.memory_space<vmem>>, %arg3: memref<4x8xf32, #tpu.memory_space<vmem>>, %arg4: memref<4x1xf32, #tpu.memory_space<vmem>>, %arg5: memref<1x4x256xf32, #tpu.memory_space<vmem>>) attributes {dimension_semantics = [#tpu.dimension_semantics<parallel>, #tpu.dimension_semantics<parallel>], iteration_bounds = array<i64: 2, 1>, scalar_prefetch = 0 : i64, scratch_operands = 0 : i64, tpu.core_type = #tpu.core_type<tc>, window_params = [{transform_indices = @transform_0, window_bounds = array<i64: 1, 8, 256>}, {pipeline_mode = #tpu.pipeline_mode<synchronous>, transform_indices = @transform_1, window_bounds = array<i64: 4, 8>}, {pipeline_mode = #tpu.pipeline_mode<synchronous>, transform_indices = @transform_2, window_bounds = array<i64: 4, 1>}, {transform_indices = @transform_3, window_bounds = array<i64: 1, 4, 256>}]} {
    %c0 = arith.constant 0 : index
    %c0_0 = arith.constant 0 : index
    %0 = vector.load %arg3[%c0, %c0_0] : memref<4x8xf32, #tpu.memory_space<vmem>>, vector<4x8xf32>
    %c0_1 = arith.constant 0 : index
    %c0_2 = arith.constant 0 : index
    %1 = vector.load %arg4[%c0_1, %c0_2] : memref<4x1xf32, #tpu.memory_space<vmem>>, vector<4x1xf32>
    %c0_3 = arith.constant 0 : index
    %c0_4 = arith.constant 0 : index
    %c0_5 = arith.constant 0 : index
    %2 = vector.load %arg2[%c0_3, %c0_4, %c0_5] : memref<1x8x256xf32, #tpu.memory_space<vmem>>, vector<1x8x256xf32>
    %3 = vector.shape_cast %2 : vector<1x8x256xf32> to vector<8x256xf32>
    %cst = arith.constant dense<0.000000e+00> : vector<4x256xf32>
    %4 = tpu.matmul %0, %3, %cst {dimension_numbers = #tpu.dot_dimension_numbers<[1], [0], [0], [1], [0, 0, 1, 1], [], []>} : vector<4x8xf32>, vector<8x256xf32>, vector<4x256xf32> -> vector<4x256xf32>
    %5 = vector.broadcast %1 : vector<4x1xf32> to vector<4x256xf32>
    %6 = arith.addf %4, %5 : vector<4x256xf32>
    %c0_6 = arith.constant 0 : index
    %c0_7 = arith.constant 0 : index
    %c0_8 = arith.constant 0 : index
    %7 = vector.load %arg5[%c0_6, %c0_7, %c0_8] : memref<1x4x256xf32, #tpu.memory_space<vmem>>, vector<1x4x256xf32>
    %8 = vector.shape_cast %7 : vector<1x4x256xf32> to vector<4x256xf32>
    %9 = vector.shape_cast %6 : vector<4x256xf32> to vector<1x4x256xf32>
    tpu.vector_store %arg5[%c0_6, %c0_7, %c0_8], %9 {strides = array<i32>} : memref<1x4x256xf32, #tpu.memory_space<vmem>>, vector<1x4x256xf32>,
    return
  }
  func.func @transform_0(%arg0: i32, %arg1: i32) -> (i32, i32, i32) {
    %c0_i32 = arith.constant 0 : i32
    %c0_i32_0 = arith.constant 0 : i32
    return %arg0, %c0_i32, %arg1 : i32, i32, i32
  }
  func.func @transform_1(%arg0: i32, %arg1: i32) -> (i32, i32) {
    %c0_i32 = arith.constant 0 : i32
    %c0_i32_0 = arith.constant 0 : i32
    %c0_i32_1 = arith.constant 0 : i32
    return %c0_i32, %c0_i32_0 : i32, i32
  }
  func.func @transform_2(%arg0: i32, %arg1: i32) -> (i32, i32) {
    %c0_i32 = arith.constant 0 : i32
    %c0_i32_0 = arith.constant 0 : i32
    %c0_i32_1 = arith.constant 0 : i32
    return %c0_i32, %c0_i32_0 : i32, i32
  }
  func.func @transform_3(%arg0: i32, %arg1: i32) -> (i32, i32, i32) {
    %c0_i32 = arith.constant 0 : i32
    %c0_i32_0 = arith.constant 0 : i32
    return %arg0, %c0_i32, %arg1 : i32, i32, i32
  }
}

</mosaic_0001>

<bundles_post_ra>
// kernel: tpu_custom_call.1
= control target key start
LH: loop header
LB: loop body
LE: loop exit
PB: predicated region body
PF: predicated region fallthrough
CT: control target
= control target key end

     0   :  { %8 = vsyncpa [#allocation3], 0  ;;  %s755_s0 = inlined_call_operand.hbm [shape: f32[2,8,256], index: 0, kind: input, shape index: {}]   ;;  %s756_s1 = inlined_call_operand.vmem [shape: f32[4,8], index: 1, kind: input, shape index: {}]   ;;  %s757_s2 = inlined_call_operand.vmem [shape: f32[4,1], index: 2, kind: input, shape index: {}]   ;;  %s758_s3 = inlined_call_operand.hbm [shape: f32[2,4,256], index: 3, kind: output, shape index: {}]  }
   0x1   :  { %10 = vsyncpa [#allocation3 + $0x1], 0 }
   0x2   :  { %11 = vsyncpa [#allocation4], 0 }
   0x3   :  { %13 = vsyncpa [#allocation4 + $0x1], 0  ;;  %s614_s12 = smov 0   ;;  %s616_s13 = smov 0  }
   0x4   :  { %s618_s14 = smov 0   ;;  %s620_s15 = smov 0  }
   0x5   :  { %s622_s16 = smov 0   ;;  %s624_s17 = smov 0  }
   0x6 LB: > { %s397_s18 = sadd.s32 4294967295, %s588_s17   ;;  %s398_s19 = sadd.s32 4294967294, %s588_s17   ;;  %s588_s17 = sphi %s624_s17, %s19_s17   ;;  %s584_s16 = sphi %s622_s16, %s770_s16   ;;  %s580_s15 = sphi %s620_s15, %s769_s15   ;;  %s576_s14 = sphi %s618_s14, %s768_s14   ;;  %s572_s13 = sphi %s616_s13, %s767_s13   ;;  %s568_s12 = sphi %s614_s12, %s766_s12  }
   0x7   : > { %s31_s20 = sadd.s32 1, %s584_s16  ;;  %s40_s21 = sadd.s32 1, %s576_s14 }
   0x8   : > { %p33_p0 = scmp.ge.s32.totalorder %s31_s20, 2  ;;  %p47_p1 = scmp.ne.s32.totalorder %s576_s14, %s572_s13 }
   0x9   : > { %p48_p2 = scmp.eq.s32.totalorder %s588_s17, 0  ;;  %p53_p3 = scmp.ne.s32.totalorder %s572_s13, %s568_s12 }
   0xa   : > { %s772_s20 = smov (%p33_p0, %s31_s20), 0  ;;  %p54_p5 = scmp.eq.s32.totalorder %s397_s18, 0 }
   0xb   : > { %p655_p4 = por %p48_p2, %p47_p1  ;;  %s35_s23 = ssub.s32 %s584_s16, %s772_s20 }
   0xc   : > { %p121_p6 = scmp.eq.s32.totalorder %s397_s18, 1  ;;  %p38_p7 = scmp.eq.s32.totalorder %s35_s23, 0 }
   0xd   : > { %p661_p8 = por %p54_p5, %p53_p3  ;;  %p127_p10 = scmp.eq.s32.totalorder %s398_s19, 1 }
   0xe   : > { %p665_p9 = por %p121_p6, %p47_p1  ;;  %p427_p13 = scmp.lt.s32.totalorder %s588_s17, 2 }
   0xf   : > { %s670_s26 = scalar_select %p38_p7, %s576_s14, %s40_s21  }
  0x10   : > { %p672_p11 = por %p127_p10, %p53_p3  ;;  %s153_s28 = sand.u32 1, %s576_s14  }
  0x11   : > { %s401_s29 = sshll.u32 %s153_s28, 4  ;;  %s413_s30 = sshll.u32 %s584_s16, 8 }
  0x12   : > { %s762_s27 = scalar_select %p672_p11, 1, 0 }
  0x13   : > { %s165_s6 = scalar_lea.hbm %s755_s0, %s413_s30  ;;  %s157_s7 = scalar_lea.vmem [#allocation2], %s401_s29 }
  0x14   : > { %s167_s8 = sshll.u32 %s157_s7, 4  ;;  %p685_p0 = pnand %p427_p13, %p655_p4  ;;  %s168_s8 = int_to_ptr.vmem [resolvable:$true] %s167_s8 }
  0x15   : > { %p404_p1 = scmp.ge.s32.totalorder %s588_s17, 1  ;;  %p172_p2 = scmp.lt.s32.totalorder %s588_s17, 3 }
  0x16   : > { %s154_s10 = scalar_lea.sflag [#allocation3], %s153_s28  ;;  %p482_p3 = pneg %p685_p0 }
  0x17   : > { %s493_s11 = scalar_lea.vmem %s168_s8, 256  ;;  %s590_s18 = smov [#allocation2]  }
  0x18   : > { %p494_p5 = scmp.ne.s32.totalorder %s168_s8, %s493_s11  ;;  %s498_s19 = sshll.u32 %s590_s18, 4  ;;  %s499_s19 = int_to_ptr.vmem [resolvable:$false] %s498_s19 }
  0x19   : > { %s500_s21 = scalar_lea.vmem %s499_s19, 512  ;;  %p501_p10 = scmp.lt.s32.totalorder %s168_s8, %s499_s19 }
  0x1a   : > { %p496_p6 = pnand %p494_p5, %p482_p3  ;;  %p502_p12 = scmp.lt.s32.totalorder %s500_s21, %s493_s11 }
  0x1c   : > { %p497_p7 = pneg %p496_p6  ;;  %p503_p4 = por %p502_p12, %p501_p10 }
  0x1e   : > { %p504_p13 = pnand %p503_p4, %p497_p7 }
  0x20   : > { %507 = shalt.err (!%p504_p13)
}
  0x21   : > { %422 = dma.hbm_to_vmem [thread:$0]  (!%p685_p0), %s165_s6, 256, %s168_s8, %s154_s10  }
  0x22   : > { %p173_p11 = pnand %p404_p1, %p172_p2 }
  0x23   : > { %s700_s22 = sand.u32 (!%p173_p11), 1, %s572_s13  }
  0x24   : > { %176 = sbr.rel (%p173_p11) target bundleno = 258 (0x102), region = 32  ;;  %s405_s23 = sshll.u32 (!%p173_p11), %s700_s22, 4 }
  0x25   : > { %s179_s28 = scalar_lea.sflag (!%p173_p11), [#allocation3], %s700_s22  ;;  %s182_s29 = scalar_lea.vmem (!%p173_p11), [#allocation2], %s405_s23 }
  0x29   : > { %559 = dma.done.wait (%p661_p8), %s179_s28, 256  }
  0x2a   : > { %561 = vsyncadd (%p661_p8), %s179_s28, 4294967040  ;;  %v591_v0 = vmov 0.0   ;;  %v592_v1 = vmov 0   ;;  %v210_v2 = vld [vmem:[%s182_s29 + $0x8] sm:$0xff]  ;;  %v209_v3 = vld [vmem:[%s182_s29] sm:$0xff]  ;;  %vm216_vm0 = vcmask 64512  }
  0x2b   : > { %284 = vmatprep.mubr.f32.mxu0 %v591_v0  ;;  %479 = vset.pattern.permute.xlu0 %v592_v1  ;;  %v207_v4 = vld [vmem:[%s756_s1] sm:$0xf]  ;;  %s406_s24 = sshll.u32 %s700_s22, 3  ;;  %s414_s7 = sshll.u32 %s580_s15, 7 }
  0x2c   : > { %250 = vmatprep.subr.mxu0 %v210_v2  ;;  %v208_v5 = vld [vmem:[%s757_s2] sm:$0xf]  ;;  %s204_s8 = scalar_lea.vmem [#allocation5], %s406_s24  ;;  %s311_s18 = scalar_lea.hbm %s758_s3, %s414_s7 }
  0x2d   : > { %251 = vmatpush1.msra.mxu0 %v209_v3  ;;  %213 = vperm.xlu0 %479, %v208_v5   ;;  %s313_s9 = sshll.u32 %s204_s8, 4  ;;  %s297_s19 = scalar_lea.sflag [#allocation4], %s700_s22  ;;  %s314_s9 = int_to_ptr.vmem [resolvable:$true] %s313_s9 }
  0x2e   : > { %407 = vmatmul.mubr.msk.f32.vlgmr.msra.gmra.mxu0 %vm216_vm0, %v207_v4  ;;  %s508_s21 = scalar_lea.vmem %s314_s9, 128  ;;  %s593_s23 = smov [#allocation5]  }
  0x2f   : > { %p509_p8 = scmp.ne.s32.totalorder %s314_s9, %s508_s21  ;;  %s512_s28 = sshll.u32 %s593_s23, 4  ;;  %s513_s28 = int_to_ptr.vmem [resolvable:$false] %s512_s28 }
  0x30   : > { %s514_s15 = scalar_lea.vmem %s513_s28, 256  ;;  %p515_p0 = scmp.lt.s32.totalorder %s314_s9, %s513_s28 }
  0x31   : > { %p510_p11 = pnand %p509_p8, %p665_p9  ;;  %p516_p1 = scmp.lt.s32.totalorder %s514_s15, %s508_s21 }
  0x33   : > { %p511_p12 = pneg %p510_p11  ;;  %p517_p2 = por %p516_p1, %p515_p0 }
  0x35   : > { %p518_p3 = pnand %p517_p2, %p511_p12 }
  0xa8   : > { %v214_v6 = vpop.permute.xlu0 %213 }
  0xee   : > { %v286_v7 = vpop.f32.mrf.mxu0 }
  0xef   : > { %v287_v9 = vadd.f32 %v286_v7, %v214_v6 }
  0xf0   : > { %v288_v8 = vpop.f32.mrf.mxu0 }
  0xf1   : > { %v289_v10 = vadd.f32 %v288_v8, %v214_v6 }
  0xf3   : > { %v293_v11 = vcombine.low %v287_v9, %v289_v10 }
  0xf5   : > { %295 = vst [vmem:[%s204_s8] sm:$0xff] %v293_v11 }
  0xf6   : > { %521 = shalt.err (!%p518_p3)
}
  0xf7   : > { %s522_s29 = scalar_lea.hbm %s311_s18, 128  ;;  %s526_s4 = scalar_lea.hbm %s758_s3, 256 }
  0xf8   : > { %p523_p5 = scmp.ne.s32.totalorder %s311_s18, %s522_s29  ;;  %p527_p10 = scmp.lt.s32.totalorder %s311_s18, %s758_s3 }
  0xf9   : > { %p528_p4 = scmp.lt.s32.totalorder %s526_s4, %s522_s29 }
  0xfa   : > { %p524_p6 = pnand %p523_p5, %p665_p9 }
  0xfb   : > { %p529_p13 = por %p528_p4, %p527_p10 }
  0xfc   : > { %p525_p7 = pneg %p524_p6 }
  0xfe   : > { %p530_p8 = pnand %p529_p13, %p525_p7 }
 0x100   : > { %533 = shalt.err (!%p530_p8)
}
 0x101   : > { %417 = dma.vmem_to_hbm [thread:$0]  (%p665_p9), %s314_s9, 128, %s311_s18, %s297_s19  }
 0x102 PF: > { %s325_s24 = sand.u32 1, %s568_s12   ;;  %p764_p11 = scmp.ne.s32.totalorder %s762_s27, 0 }
 0x103   : > { %p765_p12 = scmp.ge.s32.totalorder %s588_s17, 2  ;;  %s326_s7 = scalar_lea.sflag [#allocation4], %s325_s24 }
 0x105   : > { %p424_p0 = pnand %p765_p12, %p764_p11 }
 0x107   : > { %p425_p1 = pneg %p424_p0 }
 0x109   : > { %563 = dma.done.wait (%p425_p1), %s326_s7, 128  }
 0x10a   : > { %565 = vsyncadd (%p425_p1), %s326_s7, 4294967168  ;;  %s19_s17 = sadd.s32 1, %s588_s17   ;;  %s766_s12 = smov %s572_s13 }
 0x10b   : > { %p16_p2 = scmp.ge.s32.totalorder %s19_s17, 4   ;;  %s767_s13 = smov %s576_s14 }
 0x10c   : > { %s768_s14 = smov %s670_s26  ;;  %s769_s15 = smov %s584_s16 }
 0x10d   : > { %s770_s16 = smov %s772_s20  ;;  %18 = sbr.rel (!%p16_p2) target bundleno = 6 (0x6), region = 77 }
 0x112   :  { %331 = vsyncpa [#allocation3], 1 }
 0x113   :  { %333 = vsyncpa [#allocation3 + $0x1], 1 }
 0x114   :  { %334 = vsyncpa [#allocation4], 1 }
 0x115   :  { %336 = vsyncpa [#allocation4 + $0x1], 1 }

</bundles_post_ra>
